<compile_context>
chip_gen: v7x
topology: tpu7x:2x2x1
jax: 0.10.0
libtpu: 0.0.40
codegen_flags: <defaults>
</compile_context>

<pallas_src>
import jax
import jax.numpy as jnp
from jax.experimental import pallas as pl
from jax.experimental.pallas import tpu as pltpu


def imputation_kernel(params_ref, block_ref, mask_ref, out_ref):
    """One batch-tile per grid step.

    params_ref: SMEM, shape (C+1,) float32 -- [0:C] folded per-channel weights, [C] folded bias
    block_ref:  VMEM (TILE_N, C, H, W)     -- native layout
    mask_ref:   VMEM (TILE_N, 1, H, W)
    out_ref:    VMEM (TILE_N, 1, H, W)
    """
    C = block_ref.shape[1]
    # Unrolled scalar-broadcast FMA chain over channels (VPU; C is small).
    acc = params_ref[0] * block_ref[:, 0:1]
    for c in range(1, C):
        acc = acc + params_ref[c] * block_ref[:, c:c + 1]
    # Mask applied once after the reduction (mathematically identical: mask factors out).
    out_ref[...] = (acc * mask_ref[...] + params_ref[C]).astype(out_ref.dtype)


def imputation_net(block, center, mask, params):
    """block: (N, C, 1, H, W), center: unused, mask: (N, 1, H, W) -> (N, 1, H, W).

    params: (2*C + 5,) float32
        [0:C]        subnet1 1x1-conv weights (C -> 1)
        [C:2C]       subnet2 1x1-conv weights (C -> 1)
        [2C], [2C+1] subnet1 / subnet2 biases
        [2C+2:2C+4]  merge_layer Conv2d(2->1, 1x1) weights
        [2C+4]       merge_layer bias
    """
    del center  # not used by ImputationNet.forward
    N, C, one, H, W = block.shape
    assert one == 1

    # --- Fold subnet1 + subnet2 + merge_layer into one per-channel weight / bias. ---
    w1 = params[:C]
    w2 = params[C:2 * C]
    b1 = params[2 * C]
    b2 = params[2 * C + 1]
    wm1 = params[2 * C + 2]
    wm2 = params[2 * C + 3]
    bm = params[2 * C + 4]
    w_eff = wm1 * w1 + wm2 * w2                      # (C,)
    b_eff = wm1 * b1 + wm2 * b2 + bm                 # scalar
    folded = jnp.concatenate([w_eff, b_eff[None]]).astype(jnp.float32)   # (C+1,)

    # --- Native layout: (N, C, H, W); mask/out stay (N, 1, H, W). Free reshape only. ---
    x = block.reshape(N, C, H, W)

    # Tile over batch only. Per-step block input ~<= 2 MiB (double-buffered total
    # ~6 MiB incl. mask + out: fits v5e's 16 MiB default scoped VMEM and v7x's
    # 64 MiB physical VMEM). Cap at ceil(N/2) so >= 2 grid steps whenever N >= 2
    # (v7x megacore sharding of the "parallel" axis).
    elem_bytes = C * H * W * 4
    target_bytes = 2 << 20
    tile_n = max(1, min(max(1, target_bytes // elem_bytes), pl.cdiv(N, 2)))
    grid_n = pl.cdiv(N, tile_n)   # ragged last tile handled by Pallas (writes dropped)

    out = pl.pallas_call(
        imputation_kernel,
        out_shape=jax.ShapeDtypeStruct((N, 1, H, W), jnp.float32),
        grid_spec=pl.GridSpec(
            grid=(grid_n,),
            in_specs=[
                pl.BlockSpec(memory_space=pltpu.MemorySpace.SMEM),            # folded params
                pl.BlockSpec((tile_n, C, H, W), lambda n: (n, 0, 0, 0)),      # block (native)
                pl.BlockSpec((tile_n, 1, H, W), lambda n: (n, 0, 0, 0)),      # mask
            ],
            out_specs=pl.BlockSpec((tile_n, 1, H, W), lambda n: (n, 0, 0, 0)),
        ),
        compiler_params=pltpu.CompilerParams(dimension_semantics=("parallel",)),
    )(folded, x, mask)

    return out


def reference(block, mask, params):
    """Pure-JAX reference of the same computation (unfolded form)."""
    N, C, _, H, W = block.shape
    x = block.reshape(N, C, H, W)
    w1 = params[:C]
    w2 = params[C:2 * C]
    b1, b2, wm1, wm2, bm = params[2 * C:2 * C + 5]
    xm = x * mask                                       # mask broadcast over channels
    s1 = jnp.einsum("nchw,c->nhw", xm, w1) + b1
    s2 = jnp.einsum("nchw,c->nhw", xm, w2) + b2
    out = wm1 * s1 + wm2 * s2 + bm
    return out[:, None, :, :]


if __name__ == "__main__":
    # Small shapes consistent with the forward pass; W kept lane-dense (128).
    N, C, H, W = 2, 4, 8, 128

    key = jax.random.PRNGKey(0)
    k_block, k_center, k_mask, k_params = jax.random.split(key, 4)

    block = jax.random.normal(k_block, (N, C, 1, H, W), dtype=jnp.float32)
    center = jax.random.normal(k_center, (N, 1, H, W), dtype=jnp.float32)  # unused by forward
    mask = (jax.random.uniform(k_mask, (N, 1, H, W)) > 0.5).astype(jnp.float32)

    # Deterministic parameter init: 2*C subnet conv weights, 2 subnet biases,
    # 2 merge-layer weights, 1 merge-layer bias.
    params = 0.1 * jax.random.normal(k_params, (2 * C + 5,), dtype=jnp.float32)

    out = imputation_net(block, center, mask, params)
    out = jax.block_until_ready(out)

    ref = reference(block, mask, params)
    assert out.shape == (N, 1, H, W)
    assert jnp.allclose(out, ref, atol=1e-5, rtol=1e-5), "mismatch vs pure-JAX reference"

    print("KERNEL_OK")
</pallas_src>

<mosaic_0001>
module attributes {stable_mosaic.version = 11 : i64} {
  func.func @imputation_kernel(%arg0: i32, %arg1: memref<5xf32, #tpu.memory_space<smem>>, %arg2: memref<1x4x8x128xf32, #tpu.memory_space<vmem>>, %arg3: memref<1x1x8x128xf32, #tpu.memory_space<vmem>>, %arg4: memref<1x1x8x128xf32, #tpu.memory_space<vmem>>) attributes {dimension_semantics = [#tpu.dimension_semantics<parallel>], iteration_bounds = array<i64: 2>, scalar_prefetch = 0 : i64, scratch_operands = 0 : i64, tpu.core_type = #tpu.core_type<tc>, window_params = [{transform_indices = @transform_0, window_bounds = array<i64: 5>}, {transform_indices = @transform_1, window_bounds = array<i64: 1, 4, 8, 128>}, {transform_indices = @transform_2, window_bounds = array<i64: 1, 1, 8, 128>}, {transform_indices = @transform_3, window_bounds = array<i64: 1, 1, 8, 128>}]} {
    %c0 = arith.constant 0 : index
    %0 = memref.load %arg1[%c0] : memref<5xf32, #tpu.memory_space<smem>>
    %c0_0 = arith.constant 0 : index
    %c0_1 = arith.constant 0 : index
    %c0_2 = arith.constant 0 : index
    %c0_3 = arith.constant 0 : index
    %1 = vector.load %arg2[%c0_0, %c0_1, %c0_2, %c0_3] : memref<1x4x8x128xf32, #tpu.memory_space<vmem>>, vector<1x1x8x128xf32>
    %2 = vector.broadcast %0 : f32 to vector<1x1x8x128xf32>
    %3 = arith.mulf %2, %1 : vector<1x1x8x128xf32>
    %c1 = arith.constant 1 : index
    %4 = memref.load %arg1[%c1] : memref<5xf32, #tpu.memory_space<smem>>
    %c0_4 = arith.constant 0 : index
    %c1_5 = arith.constant 1 : index
    %c0_6 = arith.constant 0 : index
    %c0_7 = arith.constant 0 : index
    %5 = vector.load %arg2[%c0_4, %c1_5, %c0_6, %c0_7] : memref<1x4x8x128xf32, #tpu.memory_space<vmem>>, vector<1x1x8x128xf32>
    %6 = vector.broadcast %4 : f32 to vector<1x1x8x128xf32>
    %7 = arith.mulf %6, %5 : vector<1x1x8x128xf32>
    %8 = arith.addf %3, %7 : vector<1x1x8x128xf32>
    %c2 = arith.constant 2 : index
    %9 = memref.load %arg1[%c2] : memref<5xf32, #tpu.memory_space<smem>>
    %c0_8 = arith.constant 0 : index
    %c2_9 = arith.constant 2 : index
    %c0_10 = arith.constant 0 : index
    %c0_11 = arith.constant 0 : index
    %10 = vector.load %arg2[%c0_8, %c2_9, %c0_10, %c0_11] : memref<1x4x8x128xf32, #tpu.memory_space<vmem>>, vector<1x1x8x128xf32>
    %11 = vector.broadcast %9 : f32 to vector<1x1x8x128xf32>
    %12 = arith.mulf %11, %10 : vector<1x1x8x128xf32>
    %13 = arith.addf %8, %12 : vector<1x1x8x128xf32>
    %c3 = arith.constant 3 : index
    %14 = memref.load %arg1[%c3] : memref<5xf32, #tpu.memory_space<smem>>
    %c0_12 = arith.constant 0 : index
    %c3_13 = arith.constant 3 : index
    %c0_14 = arith.constant 0 : index
    %c0_15 = arith.constant 0 : index
    %15 = vector.load %arg2[%c0_12, %c3_13, %c0_14, %c0_15] : memref<1x4x8x128xf32, #tpu.memory_space<vmem>>, vector<1x1x8x128xf32>
    %16 = vector.broadcast %14 : f32 to vector<1x1x8x128xf32>
    %17 = arith.mulf %16, %15 : vector<1x1x8x128xf32>
    %18 = arith.addf %13, %17 : vector<1x1x8x128xf32>
    %c0_16 = arith.constant 0 : index
    %c0_17 = arith.constant 0 : index
    %c0_18 = arith.constant 0 : index
    %c0_19 = arith.constant 0 : index
    %19 = vector.load %arg3[%c0_16, %c0_17, %c0_18, %c0_19] : memref<1x1x8x128xf32, #tpu.memory_space<vmem>>, vector<1x1x8x128xf32>
    %20 = arith.mulf %18, %19 : vector<1x1x8x128xf32>
    %c4 = arith.constant 4 : index
    %21 = memref.load %arg1[%c4] : memref<5xf32, #tpu.memory_space<smem>>
    %22 = vector.broadcast %21 : f32 to vector<1x1x8x128xf32>
    %23 = arith.addf %20, %22 : vector<1x1x8x128xf32>
    %c0_20 = arith.constant 0 : index
    %c0_21 = arith.constant 0 : index
    %c0_22 = arith.constant 0 : index
    %c0_23 = arith.constant 0 : index
    %24 = vector.load %arg4[%c0_20, %c0_21, %c0_22, %c0_23] : memref<1x1x8x128xf32, #tpu.memory_space<vmem>>, vector<1x1x8x128xf32>
    tpu.vector_store %arg4[%c0_20, %c0_21, %c0_22, %c0_23], %23 {strides = array<i32>} : memref<1x1x8x128xf32, #tpu.memory_space<vmem>>, vector<1x1x8x128xf32>,
    return
  }
  func.func @transform_0(%arg0: i32) -> i32 {
    %c0_i32 = arith.constant 0 : i32
    %c0_i32_0 = arith.constant 0 : i32
    return %c0_i32 : i32
  }
  func.func @transform_1(%arg0: i32) -> (i32, i32, i32, i32) {
    %c0_i32 = arith.constant 0 : i32
    %c0_i32_0 = arith.constant 0 : i32
    %c0_i32_1 = arith.constant 0 : i32
    %c0_i32_2 = arith.constant 0 : i32
    return %arg0, %c0_i32, %c0_i32_0, %c0_i32_1 : i32, i32, i32, i32
  }
  func.func @transform_2(%arg0: i32) -> (i32, i32, i32, i32) {
    %c0_i32 = arith.constant 0 : i32
    %c0_i32_0 = arith.constant 0 : i32
    %c0_i32_1 = arith.constant 0 : i32
    %c0_i32_2 = arith.constant 0 : i32
    return %arg0, %c0_i32, %c0_i32_0, %c0_i32_1 : i32, i32, i32, i32
  }
  func.func @transform_3(%arg0: i32) -> (i32, i32, i32, i32) {
    %c0_i32 = arith.constant 0 : i32
    %c0_i32_0 = arith.constant 0 : i32
    %c0_i32_1 = arith.constant 0 : i32
    %c0_i32_2 = arith.constant 0 : i32
    return %arg0, %c0_i32, %c0_i32_0, %c0_i32_1 : i32, i32, i32, i32
  }
}

</mosaic_0001>

<bundles_post_ra>
// kernel: tpu_custom_call.1
= control target key start
LH: loop header
LB: loop body
LE: loop exit
PB: predicated region body
PF: predicated region fallthrough
CT: control target
= control target key end

     0   :  { %8 = vsyncpa [#allocation5], 0  ;;  %s874_s0 = inlined_call_operand.hbm [shape: f32[5], index: 0, kind: input, shape index: {}]   ;;  %s875_s1 = inlined_call_operand.hbm [shape: f32[2,4,8,128], index: 1, kind: input, shape index: {}]   ;;  %s876_s2 = inlined_call_operand.hbm [shape: f32[2,1,8,128], index: 2, kind: input, shape index: {}]   ;;  %s877_s3 = inlined_call_operand.hbm [shape: f32[2,1,8,128], index: 3, kind: output, shape index: {}]  }
   0x1   :  { %9 = vsyncpa [#allocation3], 0 }
   0x2   :  { %11 = vsyncpa [#allocation3 + $0x1], 0 }
   0x3   :  { %12 = vsyncpa [#allocation8], 0 }
   0x4   :  { %14 = vsyncpa [#allocation8 + $0x1], 0 }
   0x5   :  { %15 = vsyncpa [#allocation4], 0 }
   0x6   :  { %17 = vsyncpa [#allocation4 + $0x1], 0  ;;  %s650_s12 = smov 0   ;;  %s652_s13 = smov 0  }
   0x7   :  { %s654_s14 = smov 0   ;;  %s656_s15 = smov 0  }
   0x8 LB: > { %s671_s16 = sadd.s32 4294967295, %s622_s15   ;;  %s385_s17 = sadd.s32 4294967294, %s622_s15   ;;  %s622_s15 = sphi %s656_s15, %s899_s15   ;;  %s618_s14 = sphi %s654_s14, %s898_s14   ;;  %s614_s13 = sphi %s652_s13, %s897_s13   ;;  %s610_s12 = sphi %s650_s12, %s896_s12  }
   0x9   : > { %s675_s18 = sadd.s32 1, %s622_s15   ;;  %s51_s19 = sadd.s32 1, %s618_s14 }
   0xa   : > { %s48_s20 = ssub.s32 %s622_s15, %s675_s18  ;;  %p58_p0 = scmp.ne.s32.totalorder %s618_s14, %s614_s13 }
   0xb   : > { %p49_p1 = scmp.eq.s32.totalorder %s48_s20, 0  ;;  %p59_p2 = scmp.eq.s32.totalorder %s622_s15, 0 }
   0xc   : > { %p64_p3 = scmp.ne.s32.totalorder %s614_s13, %s610_s12  ;;  %p878_p4 = scmp.eq.s32.totalorder %s671_s16, 0 }
   0xd   : > { %s687_s21 = scalar_select %p49_p1, %s618_s14, %s51_s19  }
   0xe   : > { %p689_p5 = por %p59_p2, %p58_p0  ;;  %p695_p6 = por %p878_p4, %p64_p3 }
   0xf   : > { %p114_p7 = scmp.eq.s32.totalorder %s671_s16, 1  ;;  %p120_p8 = scmp.eq.s32.totalorder %s385_s17, 1 }
  0x10   : > { %s883_s23 = scalar_select %p695_p6, 1, 0 }
  0x11   : > { %p386_p9 = scmp.ge.s32.totalorder %s622_s15, 1  ;;  %p127_p10 = scmp.lt.s32.totalorder %s622_s15, 3 }
  0x12   : > { %p702_p11 = por %p114_p7, %p58_p0  ;;  %p706_p12 = por %p120_p8, %p64_p3 }
  0x13   : > { %p710_p13 = pnand %p386_p9, %p127_p10  ;;  %p437_p4 = scmp.lt.s32.totalorder %s622_s15, 2 }
  0x14   : > { %s884_s24 = scalar_select %p702_p11, 1, 0 }
  0x15   : > { %s885_s25 = scalar_select %p706_p12, 1, 0 }
  0x16   : > { %s886_s26 = scalar_select %p710_p13, 1, 0 }
  0x17   : > { %p421_p2 = pneg %p710_p13  ;;  %s719_s27 = sand.u32 1, %s618_s14  }
  0x18   : > { %s410_s28 = sshll.u32 %s622_s15, 9  ;;  %p887_p0 = scmp.eq.s32.totalorder %s671_s16, 0 }
  0x19   : > { %p726_p3 = pnand %p437_p4, %p689_p5  ;;  %s389_s30 = sshll.u32 %s719_s27, 5 }
  0x1a   : > { %p422_p7 = pnand %p421_p2, %p887_p0  ;;  %s475_s6 = scalar_lea.hbm %s874_s0, 16 }
  0x1b   : > { %p476_p8 = scmp.ne.s32.totalorder %s874_s0, %s475_s6  ;;  %p482_p2 = scmp.lt.u32.totalorder %s475_s6, %s874_s0 }
  0x1c   : > { %p477_p9 = pneg %p422_p7 }
  0x1e   : > { %p478_p10 = pnand %p477_p9, %p476_p8 }
  0x20   : > { %p479_p1 = pneg %p478_p10 }
  0x22   : > { %p484_p4 = pnand %p482_p2, %p479_p1 }
  0x24   : > { %487 = shalt.err (!%p484_p4)
}
  0x25   : > { %s624_s11 = smov [#allocation2]   ;;  %s746_s4 = scalar_lea.hbm %s875_s1, %s410_s28 }
  0x26   : > { %424 = dma.hbm_to_smem (!%p422_p7), %s874_s0, 16, %s624_s11, [#allocation5]  }
  0x27   : > { %s153_s5 = scalar_lea.vmem [#allocation6], %s389_s30  ;;  %s150_s7 = scalar_lea.sflag [#allocation3], %s719_s27 }
  0x28   : > { %s160_s6 = sshll.u32 %s153_s5, 4  ;;  %s488_s8 = scalar_lea.hbm %s746_s4, 512  ;;  %s748_s6 = int_to_ptr.vmem [resolvable:$true] %s160_s6 }
  0x29   : > { %p489_p5 = scmp.ne.s32.totalorder %s746_s4, %s488_s8  ;;  %p490_p1 = pneg %p726_p3 }
  0x2a   : > { %s493_s10 = scalar_lea.hbm %s875_s1, 1024  ;;  %p494_p8 = scmp.lt.u32.totalorder %s746_s4, %s875_s1 }
  0x2b   : > { %p491_p0 = pnand %p490_p1, %p489_p5  ;;  %p495_p9 = scmp.lt.u32.totalorder %s493_s10, %s488_s8 }
  0x2c   : > { %p497_p2 = scmp.lt.u32.totalorder %s488_s8, %s746_s4 }
  0x2d   : > { %p492_p7 = pneg %p491_p0  ;;  %p496_p10 = por %p495_p9, %p494_p8 }
  0x2f   : > { %p498_p4 = por %p497_p2, %p496_p10 }
  0x31   : > { %p499_p12 = pnand %p498_p4, %p492_p7 }
  0x33   : > { %502 = shalt.err (!%p499_p12)
}
  0x34   : > { %s503_s30 = scalar_lea.vmem %s748_s6, 512  ;;  %s625_s19 = smov [#allocation6]  }
  0x35   : > { %p504_p5 = scmp.ne.s32.totalorder %s748_s6, %s503_s30  ;;  %s508_s20 = sshll.u32 %s625_s19, 4  ;;  %s509_s20 = int_to_ptr.vmem [resolvable:$false] %s508_s20 }
  0x36   : > { %s510_s22 = scalar_lea.vmem %s509_s20, 1024  ;;  %p511_p6 = scmp.lt.s32.totalorder %s748_s6, %s509_s20 }
  0x37   : > { %p506_p0 = pnand %p504_p5, %p490_p1  ;;  %p512_p8 = scmp.lt.s32.totalorder %s510_s22, %s503_s30 }
  0x39   : > { %p507_p11 = pneg %p506_p0  ;;  %p513_p9 = por %p512_p8, %p511_p6 }
  0x3b   : > { %p514_p10 = pnand %p513_p9, %p507_p11 }
  0x3d   : > { %517 = shalt.err (!%p514_p10)
}
  0x3e   : > { %s626_s5 = smov 128   ;;  %s627_s8 = smov 8  }
  0x3f   : > { %428 = dma.hbm_to_vmem [thread:$0]  (!%p726_p3), %s746_s4, 512, %s748_s6, %s150_s7, %s626_s5, %s626_s5, %s627_s8  }
  0x40   : > { %s392_s9 = sshll.u32 %s719_s27, 3  ;;  %s393_s28 = sshll.u32 %s622_s15, 7 }
  0x41   : > { %s783_s17 = scalar_lea.hbm %s876_s2, %s393_s28  ;;  %s174_s30 = scalar_lea.vmem [#allocation7], %s392_s9 }
  0x42   : > { %s181_s19 = sshll.u32 %s174_s30, 4  ;;  %s171_s20 = scalar_lea.sflag [#allocation8], %s719_s27  ;;  %s182_s19 = int_to_ptr.vmem [resolvable:$true] %s181_s19 }
  0x43   : > { %s518_s22 = scalar_lea.hbm %s783_s17, 128  ;;  %s523_s7 = scalar_lea.hbm %s876_s2, 256 }
  0x44   : > { %p519_p6 = scmp.ne.s32.totalorder %s783_s17, %s518_s22  ;;  %p524_p7 = scmp.lt.u32.totalorder %s783_s17, %s876_s2 }
  0x45   : > { %p525_p2 = scmp.lt.u32.totalorder %s523_s7, %s518_s22  ;;  %p527_p5 = scmp.lt.u32.totalorder %s518_s22, %s783_s17 }
  0x46   : > { %p521_p11 = pnand %p519_p6, %p490_p1 }
  0x47   : > { %p526_p4 = por %p525_p2, %p524_p7 }
  0x48   : > { %p522_p12 = pneg %p521_p11 }
  0x49   : > { %p528_p0 = por %p527_p5, %p526_p4 }
  0x4b   : > { %p529_p8 = pnand %p528_p0, %p522_p12 }
  0x4d   : > { %532 = shalt.err (!%p529_p8)
}
  0x4e   : > { %s533_s27 = scalar_lea.vmem %s182_s19, 128  ;;  %s628_s9 = smov [#allocation7]  }
  0x4f   : > { %p534_p9 = scmp.ne.s32.totalorder %s182_s19, %s533_s27  ;;  %s538_s28 = sshll.u32 %s628_s9, 4  ;;  %s539_s28 = int_to_ptr.vmem [resolvable:$false] %s538_s28 }
  0x50   : > { %s540_s10 = scalar_lea.vmem %s539_s28, 256  ;;  %p541_p11 = scmp.lt.s32.totalorder %s182_s19, %s539_s28 }
  0x51   : > { %p536_p10 = pnand %p534_p9, %p490_p1  ;;  %p542_p13 = scmp.lt.s32.totalorder %s540_s10, %s533_s27 }
  0x53   : > { %p537_p6 = pneg %p536_p10  ;;  %p543_p2 = por %p542_p13, %p541_p11 }
  0x55   : > { %p544_p7 = pnand %p543_p2, %p537_p6 }
  0x57   : > { %547 = shalt.err (!%p544_p7)
}
  0x58   : > { %431 = dma.hbm_to_vmem [thread:$0]  (!%p726_p3), %s783_s17, 128, %s182_s19, %s171_s20  }
  0x59   : > { %p889_p12 = scmp.ne.s32.totalorder %s886_s26, 0 }
  0x5a   : > { %p890_p4 = scmp.eq.s32.totalorder (!%p889_p12), %s671_s16, 0 }
  0x5b   : > { %190 = sbr.rel (%p889_p12) target bundleno = 141 (0x8d), region = 32 }
  0x62   : > { %593 = dma.done.wait (%p890_p4), [#allocation5], 16   ;;  %p891_p1 = pmov %p890_p4 }
  0x63   : > { %s812_s11 = sand.u32 1, %s614_s13   ;;  %p892_p13 = scmp.ne.s32.totalorder %s883_s23, 0 }
  0x64   : > { %595 = vsyncadd (%p891_p1), [#allocation5], 4294967280  ;;  %s396_s30 = sshll.u32 %s812_s11, 5  ;;  %s197_s22 = scalar_lea.sflag [#allocation3], %s812_s11 }
  0x65   : > { %s200_s29 = scalar_lea.vmem [#allocation6], %s396_s30 }
  0x66   : > { %597 = dma.done.wait (%p892_p13), %s197_s22, 512  }
  0x67   : > { %599 = vsyncadd (%p892_p13), %s197_s22, 4294966784  ;;  %s397_s26 = sshll.u32 %s812_s11, 3  ;;  %s206_s17 = scalar_lea.sflag [#allocation8], %s812_s11 }
  0x68   : > { %s209_s19 = scalar_lea.vmem [#allocation7], %s397_s26 }
  0x69   : > { %601 = dma.done.wait (%p892_p13), %s206_s17, 128  }
  0x6a   : > { %603 = vsyncadd (%p892_p13), %s206_s17, 4294967168 }
  0x6b   : > { %214 = sfence }
  0x6c   : > { %s238_s20 = sld [smem:[#allocation2]]  ;;  %s399_s4 = sld [smem:[#allocation2 + $0x1]]  ;;  %v239_v0 = vld [vmem:[%s200_s29] sm:$0xff]  ;;  %v400_v1 = vld [vmem:[%s200_s29 + $0x8] sm:$0xff]  ;;  %v402_v2 = vld [vmem:[%s200_s29 + $0x10] sm:$0xff] }
  0x6d   : > { %s401_s6 = sld [smem:[#allocation2 + $0x2]]  ;;  %s403_s7 = sld [smem:[#allocation2 + $0x3]]  ;;  %v404_v7 = vld [vmem:[%s200_s29 + $0x18] sm:$0xff]  ;;  %v260_v14 = vld [vmem:[%s209_s19] sm:$0xff] }
  0x6e   : > { %s405_s5 = sld [smem:[#allocation2 + $0x4]]  ;;  %s237_s23 = scalar_lea.vmem [#allocation9], %s397_s26 }
  0x6f   : > { %s280_s8 = sshll.u32 %s237_s23, 4  ;;  %s407_s27 = sshll.u32 %s671_s16, 7  ;;  %s827_s8 = int_to_ptr.vmem [resolvable:$true] %s280_s8 }
  0x70   : > { %s832_s10 = scalar_lea.hbm %s877_s3, %s407_s27  ;;  %s267_s30 = scalar_lea.sflag [#allocation4], %s812_s11 }
  0x71   : > { %s548_s22 = scalar_lea.vmem %s827_s8, 128  ;;  %p893_p5 = scmp.ne.s32.totalorder %s884_s24, 0 }
  0x72   : > { %v240_v3 = vstv %s238_s20  ;;  %v245_v5 = vstv %s399_s4  ;;  %p549_p3 = scmp.ne.s32.totalorder %s827_s8, %s548_s22  ;;  %s629_s16 = smov [#allocation9]  }
  0x73   : > { %v241_v4 = vmul.f32 %v240_v3, %v239_v0  ;;  %v251_v6 = vstv %s401_s6  ;;  %v246_v8 = vmul.f32 %v400_v1, %v245_v5  ;;  %v257_v10 = vstv %s403_s7  ;;  %s552_s29 = sshll.u32 %s629_s16, 4  ;;  %s553_s29 = int_to_ptr.vmem [resolvable:$false] %s552_s29 }
  0x74   : > { %v252_v9 = vmul.f32 %v402_v2, %v251_v6  ;;  %v258_v12 = vmul.f32 %v404_v7, %v257_v10  ;;  %v263_v16 = vstv %s405_s5  ;;  %p550_p0 = pnand %p549_p3, %p893_p5  ;;  %s554_s26 = scalar_lea.vmem %s553_s29, 256 }
  0x75   : > { %v247_v11 = vadd.f32 %v246_v8, %v241_v4  ;;  %p555_p9 = scmp.lt.s32.totalorder %s827_s8, %s553_s29  ;;  %p556_p10 = scmp.lt.s32.totalorder %s554_s26, %s548_s22 }
  0x76   : > { %p551_p8 = pneg %p550_p0 }
  0x77   : > { %v253_v13 = vadd.f32 %v252_v9, %v247_v11  ;;  %p557_p6 = por %p556_p10, %p555_p9 }
  0x79   : > { %v259_v15 = vadd.f32 %v258_v12, %v253_v13  ;;  %p558_p11 = pnand %p557_p6, %p551_p8 }
  0x7b   : > { %v261_v17 = vmul.f32 %v260_v14, %v259_v15 }
  0x7d   : > { %v264_v18 = vadd.f32 %v263_v16, %v261_v17 }
  0x7f   : > { %265 = vst [vmem:[%s237_s23] sm:$0xff] %v264_v18 }
  0x80   : > { %561 = shalt.err (!%p558_p11)
}
  0x81   : > { %s562_s11 = scalar_lea.hbm %s832_s10, 128  ;;  %s566_s20 = scalar_lea.hbm %s877_s3, 256 }
  0x82   : > { %p563_p2 = scmp.ne.s32.totalorder %s832_s10, %s562_s11  ;;  %p567_p4 = scmp.lt.u32.totalorder %s832_s10, %s877_s3 }
  0x83   : > { %p568_p1 = scmp.lt.u32.totalorder %s566_s20, %s562_s11  ;;  %p570_p3 = scmp.lt.u32.totalorder %s562_s11, %s832_s10 }
  0x84   : > { %p564_p7 = pnand %p563_p2, %p893_p5 }
  0x85   : > { %p569_p13 = por %p568_p1, %p567_p4 }
  0x86   : > { %p565_p12 = pneg %p564_p7 }
  0x87   : > { %p571_p0 = por %p570_p3, %p569_p13 }
  0x89   : > { %p572_p8 = pnand %p571_p0, %p565_p12 }
  0x8b   : > { %575 = shalt.err (!%p572_p8)
}
  0x8c   : > { %419 = dma.vmem_to_hbm [thread:$0]  (%p893_p5), %s827_s8, 128, %s832_s10, %s267_s30  }
  0x8d PF: > { %s292_s7 = sand.u32 1, %s610_s12   ;;  %p894_p9 = scmp.ne.s32.totalorder %s885_s25, 0 }
  0x8e   : > { %p895_p10 = scmp.ge.s32.totalorder %s622_s15, 2  ;;  %s293_s5 = scalar_lea.sflag [#allocation4], %s292_s7 }
  0x90   : > { %p433_p6 = pnand %p895_p10, %p894_p9 }
  0x92   : > { %605 = dma.done.wait (!%p433_p6), %s293_s5, 128  }
  0x93   : > { %607 = vsyncadd (!%p433_p6), %s293_s5, 4294967168  ;;  %p20_p11 = scmp.ge.s32.totalorder %s675_s18, 4   ;;  %s896_s12 = smov %s614_s13 }
  0x94   : > { %s897_s13 = smov %s618_s14  ;;  %s898_s14 = smov %s687_s21 }
  0x95   : > { %s899_s15 = smov %s675_s18  ;;  %22 = sbr.rel (!%p20_p11) target bundleno = 8 (0x8), region = 98 }
  0x9c   :  { %298 = vsyncpa [#allocation3], 1 }
  0x9d   :  { %300 = vsyncpa [#allocation3 + $0x1], 1 }
  0x9e   :  { %301 = vsyncpa [#allocation8], 1 }
  0x9f   :  { %303 = vsyncpa [#allocation8 + $0x1], 1 }
  0xa0   :  { %304 = vsyncpa [#allocation4], 1 }
  0xa1   :  { %306 = vsyncpa [#allocation4 + $0x1], 1 }
  0xa2   :  { %307 = vsyncpa [#allocation5], 1 }
  0xa3   :  { %309 = vsyncpa [#allocation5 + $0x1], 1 }

</bundles_post_ra>
